<compile_context>
chip_gen: v7x
topology: tpu7x:2x2x1
jax: 0.10.0
libtpu: 0.0.40
codegen_flags: <defaults>
</compile_context>

<pallas_src>
import jax
import jax.numpy as jnp
from jax.experimental import pallas as pl
from jax.experimental.pallas import tpu as pltpu


# --------------------------------------------------------------------------
# Pallas kernel: per batch row, (K, C) @ (C, T) 1x1-conv matmul + f32 bias
# --------------------------------------------------------------------------
def _cls_seg_kernel(x_ref, w_ref, b_ref, o_ref):
    # x_ref: (Nb, C, T)  io_dtype  pixels, lane-major spatial tile
    # w_ref: (K, C)      io_dtype  full conv_seg weight, grid-resident
    # b_ref: (K, 1)      float32   bias column (added post-accumulation, f32)
    # o_ref: (Nb, K, T)  io_dtype  lane-dense output tile
    w = w_ref[...]
    b = b_ref[...]
    for i in range(x_ref.shape[0]):  # static unroll over the batch rows in the block
        acc = jnp.dot(w, x_ref[i], preferred_element_type=jnp.float32)
        o_ref[i] = (acc + b).astype(o_ref.dtype)


def _round_up(x, m):
    return ((x + m - 1) // m) * m


def _choose_blocks(N, C, K, HW, in_bytes, out_bytes, *, vmem_block_budget, max_nb=16):
    """Pick (Nb, t_hw) so the double-buffered in+out blocks fill most of the
    per-generation-safe VMEM budget while keeping >=2 parallel grid steps."""
    hw_al = _round_up(max(HW, 1), 128)
    # double-buffered bytes per lane per batch row (input block + output block)
    per_lane = 2 * (C * in_bytes + K * out_bytes)
    t_max = max(128, (vmem_block_budget // per_lane) // 128 * 128)
    t_hw = min(hw_al, t_max)

    nb = 1
    if t_hw >= hw_al:
        # one spatial tile covers all of H*W -> fold batch rows into the block
        nb = max(1, min(N, max_nb, int(vmem_block_budget // (per_lane * t_hw))))

    hw_steps = pl.cdiv(HW, t_hw)
    if hw_steps == 1 and N > 1:
        # keep >=2 (target ~4) grid steps so both v7x TensorCores get work
        nb = min(nb, max(1, -(-N // 4)))
    return nb, t_hw


def conv_seg_1x1(feat_nchw, weight_kc, bias_k, *, io_dtype=jnp.bfloat16,
                 vmem_block_budget=24 * 1024 * 1024):
    """1x1 Conv2d (NCHW) as a Pallas matmul; NCHW-native, bf16 I/O, lane-dense.

    feat_nchw: (N, C, H, W)
    weight_kc: (K, C)       (the (K, C, 1, 1) conv kernel squeezed)
    bias_k   : (K,)
    returns  : (N, K, H, W) in io_dtype
    """
    N, C, H, W = feat_nchw.shape
    K = weight_kc.shape[0]
    HW = H * W

    in_bytes = jnp.dtype(io_dtype).itemsize
    out_bytes = in_bytes
    nb, t_hw = _choose_blocks(N, C, K, HW, in_bytes, out_bytes,
                              vmem_block_budget=vmem_block_budget)

    # (N, C, H, W) -> (N, C, HW): contiguous view.  bf16 cast halves the
    # dominant HBM traffic; the kernel accumulates in f32 on the MXU.
    x = feat_nchw.reshape(N, C, HW).astype(io_dtype)
    w = weight_kc.astype(io_dtype)                   # (K, C), natural orientation
    b = bias_k.reshape(K, 1).astype(jnp.float32)     # f32 bias column

    grid = (pl.cdiv(N, nb), pl.cdiv(HW, t_hw))       # both axes independent -> parallel

    cost = pl.CostEstimate(
        flops=2 * N * HW * C * K,
        transcendentals=0,
        bytes_accessed=N * HW * (C * in_bytes + K * out_bytes)
        + C * K * in_bytes + K * 4,
    )

    out = pl.pallas_call(
        _cls_seg_kernel,
        out_shape=jax.ShapeDtypeStruct((N, K, HW), io_dtype),
        grid=grid,
        in_specs=[
            pl.BlockSpec((nb, C, t_hw), lambda n, i: (n, 0, i)),  # pixels (lane-major)
            pl.BlockSpec((K, C), lambda n, i: (0, 0)),            # full weight, resident
            pl.BlockSpec((K, 1), lambda n, i: (0, 0)),            # f32 bias column
        ],
        out_specs=pl.BlockSpec((nb, K, t_hw), lambda n, i: (n, 0, i)),
        compiler_params=pltpu.CompilerParams(
            dimension_semantics=("parallel", "parallel"),
            vmem_limit_bytes=32 * 1024 * 1024,   # raise v5e's 16 MiB scoped default
        ),
        cost_estimate=cost,
    )(x, w, b)

    # No pad / slice: ragged edge blocks (HW or N not multiples of the block)
    # are masked on store by Pallas.  Reshape is a view, no data movement.
    return out.reshape(N, K, H, W)


# --------------------------------------------------------------------------
# JAX port of BaseDecodeHead_clips2 (the concrete, non-abstract parts)
# --------------------------------------------------------------------------
class BaseDecodeHeadClips2:
    def __init__(self, in_channels, channels, *, num_classes, dropout_ratio=0.1,
                 in_index=-1, input_transform=None, ignore_index=255,
                 align_corners=False, num_clips=5, io_dtype=jnp.bfloat16, key=None):
        if input_transform is not None:
            assert input_transform in ("multiple_select",), \
                "only input_transform in (None, 'multiple_select') supported here"
            assert isinstance(in_channels, (list, tuple))
            assert isinstance(in_index, (list, tuple))
        else:
            assert isinstance(in_channels, int) and isinstance(in_index, int)
        self.in_channels = in_channels
        self.channels = channels
        self.num_classes = num_classes
        self.dropout_ratio = dropout_ratio
        self.in_index = in_index
        self.input_transform = input_transform
        self.ignore_index = ignore_index
        self.align_corners = align_corners
        self.num_clips = num_clips
        self.io_dtype = io_dtype

        # conv_seg = nn.Conv2d(channels, num_classes, kernel_size=1)
        # init_weights(): normal_init(mean=0, std=0.01), bias=0 — deterministic.
        key = key if key is not None else jax.random.PRNGKey(0)
        self.conv_seg_weight = 0.01 * jax.random.normal(
            key, (num_classes, channels), dtype=jnp.float32)  # (K, C)
        self.conv_seg_bias = jnp.zeros((num_classes,), dtype=jnp.float32)

    def _transform_inputs(self, inputs):
        # TODO(synk): 'resize_concat' (bilinear resize + concat) not implemented.
        if self.input_transform == "multiple_select":
            return [inputs[i] for i in self.in_index]
        return inputs[self.in_index]

    def cls_seg(self, feat):
        """Classify each pixel (Pallas hot path)."""
        # Dropout2d is identity at inference time.
        # TODO(synk): training-mode Dropout2d (channel-wise mask via pltpu PRNG).
        return conv_seg_1x1(feat, self.conv_seg_weight, self.conv_seg_bias,
                            io_dtype=self.io_dtype)

    # forward() is abstract in the reference module; subclasses build `feat`
    # of shape (batch*num_clips, channels, H, W) and call cls_seg on it.


# --------------------------------------------------------------------------
# main
# --------------------------------------------------------------------------
if __name__ == "__main__":
    key = jax.random.PRNGKey(0)
    k_w, k_x, k_b = jax.random.split(key, 3)

    batch, num_clips = 2, 2
    channels = 32          # channels after decode modules, before conv_seg
    num_classes = 8
    H = W = 16

    head = BaseDecodeHeadClips2(
        in_channels=64, channels=channels, num_classes=num_classes,
        in_index=-1, num_clips=num_clips, key=k_w)
    # Non-zero bias so the bias path is exercised.
    head.conv_seg_bias = 0.1 * jax.random.normal(
        k_b, (num_classes,), dtype=jnp.float32)

    # Multi-level features; only the selected (last) one is used here.  The
    # subclass forward would produce `feat`; we feed it directly to cls_seg.
    feat = jax.random.normal(
        k_x, (batch * num_clips, channels, H, W), dtype=jnp.float32)
    inputs = [feat]

    selected = head._transform_inputs(inputs)
    out = head.cls_seg(selected)                    # (batch*num_clips, K, H, W)
    out = jax.block_until_ready(out)
    assert out.shape == (batch * num_clips, num_classes, H, W)

    # Correctness check against a plain-JAX reference that applies the same
    # bf16 input quantization but accumulates in f32 (as the kernel does).
    x_q = selected.astype(jnp.bfloat16).astype(jnp.float32)
    w_q = head.conv_seg_weight.astype(jnp.bfloat16).astype(jnp.float32)
    ref = jnp.einsum("nchw,kc->nkhw", x_q, w_q) \
        + head.conv_seg_bias[None, :, None, None]
    assert jnp.allclose(out.astype(jnp.float32), ref, atol=1e-2, rtol=1e-2)

    print("KERNEL_OK")
</pallas_src>

<mosaic_0001>
module attributes {stable_mosaic.version = 11 : i64} {
  func.func @_cls_seg_kernel(%arg0: i32, %arg1: i32, %arg2: memref<1x32x256xbf16, #tpu.memory_space<vmem>>, %arg3: memref<8x32xbf16, #tpu.memory_space<vmem>>, %arg4: memref<8x1xf32, #tpu.memory_space<vmem>>, %arg5: memref<1x8x256xbf16, #tpu.memory_space<vmem>>) attributes {dimension_semantics = [#tpu.dimension_semantics<parallel>, #tpu.dimension_semantics<parallel>], iteration_bounds = array<i64: 4, 1>, scalar_prefetch = 0 : i64, scratch_operands = 0 : i64, tpu.core_type = #tpu.core_type<tc>, window_params = [{transform_indices = @transform_0, window_bounds = array<i64: 1, 32, 256>}, {pipeline_mode = #tpu.pipeline_mode<synchronous>, transform_indices = @transform_1, window_bounds = array<i64: 8, 32>}, {pipeline_mode = #tpu.pipeline_mode<synchronous>, transform_indices = @transform_2, window_bounds = array<i64: 8, 1>}, {transform_indices = @transform_3, window_bounds = array<i64: 1, 8, 256>}]} {
    %c0 = arith.constant 0 : index
    %c0_0 = arith.constant 0 : index
    %0 = vector.load %arg3[%c0, %c0_0] : memref<8x32xbf16, #tpu.memory_space<vmem>>, vector<8x32xbf16>
    %c0_1 = arith.constant 0 : index
    %c0_2 = arith.constant 0 : index
    %1 = vector.load %arg4[%c0_1, %c0_2] : memref<8x1xf32, #tpu.memory_space<vmem>>, vector<8x1xf32>
    %c0_3 = arith.constant 0 : index
    %c0_4 = arith.constant 0 : index
    %c0_5 = arith.constant 0 : index
    %2 = vector.load %arg2[%c0_3, %c0_4, %c0_5] : memref<1x32x256xbf16, #tpu.memory_space<vmem>>, vector<1x32x256xbf16>
    %3 = vector.shape_cast %2 : vector<1x32x256xbf16> to vector<32x256xbf16>
    %cst = arith.constant dense<0.000000e+00> : vector<8x256xf32>
    %4 = tpu.matmul %0, %3, %cst {dimension_numbers = #tpu.dot_dimension_numbers<[1], [0], [0], [1], [0, 0, 1, 1], [], []>} : vector<8x32xbf16>, vector<32x256xbf16>, vector<8x256xf32> -> vector<8x256xf32>
    %5 = vector.broadcast %1 : vector<8x1xf32> to vector<8x256xf32>
    %6 = arith.addf %4, %5 : vector<8x256xf32>
    %7 = arith.truncf %6 : vector<8x256xf32> to vector<8x256xbf16>
    %c0_6 = arith.constant 0 : index
    %c0_7 = arith.constant 0 : index
    %c0_8 = arith.constant 0 : index
    %8 = vector.load %arg5[%c0_6, %c0_7, %c0_8] : memref<1x8x256xbf16, #tpu.memory_space<vmem>>, vector<1x8x256xbf16>
    %9 = vector.shape_cast %8 : vector<1x8x256xbf16> to vector<8x256xbf16>
    %10 = vector.shape_cast %7 : vector<8x256xbf16> to vector<1x8x256xbf16>
    tpu.vector_store %arg5[%c0_6, %c0_7, %c0_8], %10 {strides = array<i32>} : memref<1x8x256xbf16, #tpu.memory_space<vmem>>, vector<1x8x256xbf16>,
    return
  }
  func.func @transform_0(%arg0: i32, %arg1: i32) -> (i32, i32, i32) {
    %c0_i32 = arith.constant 0 : i32
    %c0_i32_0 = arith.constant 0 : i32
    return %arg0, %c0_i32, %arg1 : i32, i32, i32
  }
  func.func @transform_1(%arg0: i32, %arg1: i32) -> (i32, i32) {
    %c0_i32 = arith.constant 0 : i32
    %c0_i32_0 = arith.constant 0 : i32
    %c0_i32_1 = arith.constant 0 : i32
    return %c0_i32, %c0_i32_0 : i32, i32
  }
  func.func @transform_2(%arg0: i32, %arg1: i32) -> (i32, i32) {
    %c0_i32 = arith.constant 0 : i32
    %c0_i32_0 = arith.constant 0 : i32
    %c0_i32_1 = arith.constant 0 : i32
    return %c0_i32, %c0_i32_0 : i32, i32
  }
  func.func @transform_3(%arg0: i32, %arg1: i32) -> (i32, i32, i32) {
    %c0_i32 = arith.constant 0 : i32
    %c0_i32_0 = arith.constant 0 : i32
    return %arg0, %c0_i32, %arg1 : i32, i32, i32
  }
}

</mosaic_0001>

<bundles_post_ra>
// kernel: tpu_custom_call.1
= control target key start
LH: loop header
LB: loop body
LE: loop exit
PB: predicated region body
PF: predicated region fallthrough
CT: control target
= control target key end

     0   :  { %8 = vsyncpa [#allocation3], 0  ;;  %s809_s0 = inlined_call_operand.hbm [shape: bf16[4,32,256], index: 0, kind: input, shape index: {}]   ;;  %s810_s1 = inlined_call_operand.vmem [shape: bf16[8,32], index: 1, kind: input, shape index: {}]   ;;  %s811_s2 = inlined_call_operand.vmem [shape: f32[8,1], index: 2, kind: input, shape index: {}]   ;;  %s812_s3 = inlined_call_operand.hbm [shape: bf16[4,8,256], index: 3, kind: output, shape index: {}]  }
   0x1   :  { %10 = vsyncpa [#allocation3 + $0x1], 0 }
   0x2   :  { %11 = vsyncpa [#allocation4], 0 }
   0x3   :  { %13 = vsyncpa [#allocation4 + $0x1], 0  ;;  %s631_s12 = smov 0   ;;  %s633_s13 = smov 0  }
   0x4   :  { %s635_s14 = smov 0   ;;  %s637_s15 = smov 0  }
   0x5   :  { %s639_s16 = smov 0   ;;  %s641_s17 = smov 0  }
   0x6 LB: > { %s396_s18 = sadd.s32 4294967295, %s604_s17   ;;  %s397_s19 = sadd.s32 4294967294, %s604_s17   ;;  %s604_s17 = sphi %s641_s17, %s19_s17   ;;  %s600_s16 = sphi %s639_s16, %s826_s16   ;;  %s596_s15 = sphi %s637_s15, %s825_s15   ;;  %s592_s14 = sphi %s635_s14, %s824_s14   ;;  %s588_s13 = sphi %s633_s13, %s823_s13   ;;  %s584_s12 = sphi %s631_s12, %s822_s12  }
   0x7   : > { %s31_s20 = sadd.s32 1, %s600_s16  ;;  %s40_s21 = sadd.s32 1, %s592_s14 }
   0x8   : > { %p33_p0 = scmp.ge.s32.totalorder %s31_s20, 4  ;;  %p47_p1 = scmp.ne.s32.totalorder %s592_s14, %s588_s13 }
   0x9   : > { %p48_p2 = scmp.eq.s32.totalorder %s604_s17, 0  ;;  %p53_p3 = scmp.ne.s32.totalorder %s588_s13, %s584_s12 }
   0xa   : > { %s828_s20 = smov (%p33_p0, %s31_s20), 0  ;;  %p54_p5 = scmp.eq.s32.totalorder %s396_s18, 0 }
   0xb   : > { %p672_p4 = por %p48_p2, %p47_p1  ;;  %s35_s23 = ssub.s32 %s600_s16, %s828_s20 }
   0xc   : > { %p121_p6 = scmp.eq.s32.totalorder %s396_s18, 3  ;;  %p38_p7 = scmp.eq.s32.totalorder %s35_s23, 0 }
   0xd   : > { %p678_p8 = por %p54_p5, %p53_p3  ;;  %p127_p10 = scmp.eq.s32.totalorder %s397_s19, 3 }
   0xe   : > { %p682_p9 = por %p121_p6, %p47_p1  ;;  %p432_p12 = scmp.lt.s32.totalorder %s604_s17, 4 }
   0xf   : > { %s687_s26 = scalar_select %p38_p7, %s592_s14, %s40_s21  }
  0x10   : > { %s816_s25 = scalar_select %p682_p9, 1, 0 }
  0x11   : > { %p689_p11 = por %p127_p10, %p53_p3  ;;  %s153_s28 = sand.u32 1, %s592_s14  }
  0x12   : > { %s400_s29 = sshll.u32 %s153_s28, 5  ;;  %s417_s30 = sshll.u32 %s600_s16, 9 }
  0x13   : > { %s817_s27 = scalar_select %p689_p11, 1, 0 }
  0x14   : > { %s699_s6 = scalar_lea.hbm %s809_s0, %s417_s30  ;;  %s157_s7 = scalar_lea.vmem [#allocation2], %s400_s29 }
  0x15   : > { %s166_s8 = sshll.u32 %s157_s7, 4  ;;  %p705_p13 = pnand %p432_p12, %p672_p4  ;;  %s701_s8 = int_to_ptr.vmem [resolvable:$true] %s166_s8 }
  0x16   : > { %s710_s10 = scalar_lea.sflag [#allocation3], %s153_s28  ;;  %s492_s11 = scalar_lea.hbm %s699_s6, 512 }
  0x17   : > { %p493_p1 = scmp.ne.s32.totalorder %s699_s6, %s492_s11  ;;  %p494_p2 = pneg %p705_p13 }
  0x18   : > { %s497_s21 = scalar_lea.hbm %s809_s0, 2048  ;;  %p498_p4 = scmp.lt.u32.totalorder %s699_s6, %s809_s0 }
  0x19   : > { %p495_p3 = pnand %p494_p2, %p493_p1  ;;  %p499_p6 = scmp.lt.u32.totalorder %s497_s21, %s492_s11 }
  0x1a   : > { %p501_p10 = scmp.lt.u32.totalorder %s492_s11, %s699_s6 }
  0x1b   : > { %p496_p5 = pneg %p495_p3  ;;  %p500_p7 = por %p499_p6, %p498_p4 }
  0x1d   : > { %p502_p12 = por %p501_p10, %p500_p7 }
  0x1f   : > { %p503_p0 = pnand %p502_p12, %p496_p5 }
  0x21   : > { %506 = shalt.err (!%p503_p0)
}
  0x22   : > { %s507_s28 = scalar_lea.vmem %s701_s8, 512  ;;  %s606_s29 = smov [#allocation2]  }
  0x23   : > { %p508_p1 = scmp.ne.s32.totalorder %s701_s8, %s507_s28  ;;  %s512_s30 = sshll.u32 %s606_s29, 4  ;;  %s513_s30 = int_to_ptr.vmem [resolvable:$false] %s512_s30 }
  0x24   : > { %s514_s4 = scalar_lea.vmem %s513_s30, 1024  ;;  %p515_p9 = scmp.lt.s32.totalorder %s701_s8, %s513_s30 }
  0x25   : > { %p510_p3 = pnand %p508_p1, %p494_p2  ;;  %p516_p4 = scmp.lt.s32.totalorder %s514_s4, %s507_s28 }
  0x27   : > { %p511_p11 = pneg %p510_p3  ;;  %p517_p6 = por %p516_p4, %p515_p9 }
  0x29   : > { %p518_p7 = pnand %p517_p6, %p511_p11 }
  0x2b   : > { %521 = shalt.err (!%p518_p7)
}
  0x2c   : > { %s607_s5 = smov 128   ;;  %s608_s7 = smov 8  }
  0x2d   : > { %427 = dma.hbm_to_vmem [thread:$0]  (!%p705_p13), %s699_s6, 512, %s701_s8, %s710_s10, %s607_s5, %s607_s5, %s608_s7  }
  0x2e   : > { %p174_p0 = scmp.lt.s32.totalorder %s604_s17, 5  ;;  %p819_p2 = scmp.ge.s32.totalorder %s604_s17, 1 }
  0x30   : > { %p175_p5 = pnand %p819_p2, %p174_p0 }
  0x31   : > { %s742_s11 = sand.u32 (!%p175_p5), 1, %s588_s13  }
  0x32   : > { %178 = sbr.rel (%p175_p5) target bundleno = 299 (0x12b), region = 32  ;;  %s404_s18 = sshll.u32 (!%p175_p5), %s742_s11, 5 }
  0x33   : > { %s181_s19 = scalar_lea.sflag (!%p175_p5), [#allocation3], %s742_s11  ;;  %s184_s21 = scalar_lea.vmem (!%p175_p5), [#allocation2], %s404_s18 }
  0x39   : > { %575 = dma.done.wait (%p678_p8), %s181_s19, 512  }
  0x3a   : > { %577 = vsyncadd (%p678_p8), %s181_s19, 4294966784  ;;  %v609_v0 = vmov 0   ;;  %v486_v1 = vld [vmem:[%s184_s21 + $0x4] ss:$8 sps:$4 sm:$0xff]   ;;  %v488_v2 = vld [vmem:[%s184_s21] ss:$8 sps:$4 sm:$0xff]  }
  0x3b   : > { %277 = vmatprep.mubr.bf16.mxu0 %v609_v0  ;;  %485 = vset.pattern.permute.xlu0 %v609_v0  ;;  %v489_v3 = vld [vmem:[%s184_s21 + $0x14] ss:$8 sps:$4 sm:$0xff]   ;;  %v491_v4 = vld [vmem:[%s184_s21 + $0x10] ss:$8 sps:$4 sm:$0xff]   ;;  %v211_v5 = vld [vmem:[%s811_s2] sm:$0xff]  ;;  %vm241_vm0 = vcmask 261120  }
  0x3c   : > { %245 = vmatprep.subr.bf16.mxu0 %v486_v1  ;;  %218 = vperm.xlu0 %485, %v211_v5   ;;  %v210_v6 = vld [vmem:[%s810_s1] sm:$0xf]  ;;  %s405_s10 = sshll.u32 %s742_s11, 3  ;;  %s419_s22 = sshll.u32 %s596_s15, 7 }
  0x3d   : > { %246 = vmatpush1.bf16.msra.mxu0 %v488_v2  ;;  %s206_s23 = scalar_lea.vmem [#allocation5], %s405_s10  ;;  %s761_s4 = scalar_lea.hbm %s812_s3, %s419_s22 }
  0x3e   : > { %247 = vmatprep.subr.bf16.mxu0 %v489_v3  ;;  %s312_s28 = sshll.u32 %s206_s23, 4  ;;  %s296_s5 = scalar_lea.sflag [#allocation4], %s742_s11  ;;  %s763_s28 = int_to_ptr.vmem [resolvable:$true] %s312_s28 }
  0x3f   : > { %s522_s7 = scalar_lea.vmem %s763_s28, 128  ;;  %p820_p9 = scmp.ne.s32.totalorder %s816_s25, 0 }
  0x40   : > { %p523_p8 = scmp.ne.s32.totalorder %s763_s28, %s522_s7  ;;  %s610_s15 = smov [#allocation5]  }
  0x41   : > { %248 = vmatpush1.bf16.msra.mxu0 %v491_v4  ;;  %s526_s18 = sshll.u32 %s610_s15, 4  ;;  %s527_s18 = int_to_ptr.vmem [resolvable:$false] %s526_s18 }
  0x42   : > { %p524_p11 = pnand %p523_p8, %p820_p9  ;;  %s528_s19 = scalar_lea.vmem %s527_s18, 256 }
  0x43   : > { %p529_p10 = scmp.lt.s32.totalorder %s763_s28, %s527_s18  ;;  %p530_p12 = scmp.lt.s32.totalorder %s528_s19, %s522_s7 }
  0x44   : > { %410 = vmatmul.mubr.msk.bf16.vlgmr.msra.gmra.mrb[0].mxu0 %vm241_vm0, %v210_v6  ;;  %p525_p13 = pneg %p524_p11 }
  0x45   : > { %p531_p1 = por %p530_p12, %p529_p10 }
  0x47   : > { %p532_p3 = pnand %p531_p1, %p525_p13 }
  0xbb   : > { %v219_v7 = vpop.permute.xlu0 %218 }
 0x117   : > { %v279_v8 = vpop.f32.mrb[0].mxu0 }
 0x118   : > { %v280_v9 = vadd.f32 %v279_v8, %v219_v7  ;;  %v281_v10 = vpop.f32.mrb[1].mxu0 }
 0x119   : > { %v282_v11 = vadd.f32 %v281_v10, %v219_v7  ;;  %v283_v12 = vpop.f32.mrb[2].mxu0 }
 0x11a   : > { %v284_v13 = vpop.f32.mrb[3].mxu0 }
 0x11b   : > { %v418_v14 = vpack.c.bf16 %v282_v11, %v280_v9 }
 0x11d   : > { %294 = vst [vmem:[%s206_s23] sm:$0xff] %v418_v14 }
 0x11e   : > { %535 = shalt.err (!%p532_p3)
}
 0x11f   : > { %s536_s11 = scalar_lea.hbm %s761_s4, 128  ;;  %s540_s8 = scalar_lea.hbm %s812_s3, 512 }
 0x120   : > { %p537_p4 = scmp.ne.s32.totalorder %s761_s4, %s536_s11  ;;  %p541_p0 = scmp.lt.u32.totalorder %s761_s4, %s812_s3 }
 0x121   : > { %p542_p2 = scmp.lt.u32.totalorder %s540_s8, %s536_s11  ;;  %p544_p8 = scmp.lt.u32.totalorder %s536_s11, %s761_s4 }
 0x122   : > { %p538_p6 = pnand %p537_p4, %p820_p9 }
 0x123   : > { %p543_p5 = por %p542_p2, %p541_p0 }
 0x124   : > { %p539_p7 = pneg %p538_p6 }
 0x125   : > { %p545_p11 = por %p544_p8, %p543_p5 }
 0x127   : > { %p546_p13 = pnand %p545_p11, %p539_p7 }
 0x129   : > { %549 = shalt.err (!%p546_p13)
}
 0x12a   : > { %422 = dma.vmem_to_hbm [thread:$0]  (%p820_p9), %s763_s28, 128, %s761_s4, %s296_s5  }
 0x12b PF: > { %p433_p10 = scmp.ge.s32.totalorder %s604_s17, 2  ;;  %s324_s10 = sand.u32 1, %s584_s12  }
 0x12c   : > { %p821_p12 = scmp.ne.s32.totalorder %s817_s27, 0  ;;  %s325_s22 = scalar_lea.sflag [#allocation4], %s324_s10 }
 0x12e   : > { %p429_p1 = pnand %p433_p10, %p821_p12 }
 0x130   : > { %579 = dma.done.wait (!%p429_p1), %s325_s22, 128  }
 0x131   : > { %581 = vsyncadd (!%p429_p1), %s325_s22, 4294967168  ;;  %s19_s17 = sadd.s32 1, %s604_s17   ;;  %s822_s12 = smov %s588_s13 }
 0x132   : > { %p16_p3 = scmp.ge.s32.totalorder %s19_s17, 6   ;;  %s823_s13 = smov %s592_s14 }
 0x133   : > { %s824_s14 = smov %s687_s26  ;;  %s825_s15 = smov %s600_s16 }
 0x134   : > { %s826_s16 = smov %s828_s20  ;;  %18 = sbr.rel (!%p16_p3) target bundleno = 6 (0x6), region = 77 }
 0x13b   :  { %330 = vsyncpa [#allocation3], 1 }
 0x13c   :  { %332 = vsyncpa [#allocation3 + $0x1], 1 }
 0x13d   :  { %333 = vsyncpa [#allocation4], 1 }
 0x13e   :  { %335 = vsyncpa [#allocation4 + $0x1], 1 }

</bundles_post_ra>
